<compile_context>
chip_gen: v5e
topology: v5e:2x2
jax: 0.10.0
libtpu: 0.0.40
codegen_flags: <defaults>
</compile_context>

<pallas_src>
import math

import jax
import jax.numpy as jnp
from jax.experimental import pallas as pl
from jax.experimental.pallas import tpu as pltpu


def _attn_kernel_single_pass(x_ref, wc_ref, out_ref):
    # x_ref  : (TB, S, V)  input tile (native dtype), whole seq axis resident
    # wc_ref : (1, V)      precomputed context^T @ W (f32), bias dropped
    # out_ref: (TB, V)     output tile
    xf = x_ref[...].astype(jnp.float32)                  # (TB, S, V)
    wc = wc_ref[...].astype(jnp.float32)                 # (1, V)

    # vu[b, t] = sum_v x[b, t, v] * wc[v]   (lane reduce, no MXU)
    # TODO(synk): for V < 128, lane-densify this reduce (reshape x to
    # (B, S//k, k*V) with k = 128 // V, or push vu onto the idle MXU) to
    # recover VPU lane occupancy on v6e/v7x; skipped to keep layout simple.
    vu = jnp.sum(xf * wc[None, :, :], axis=-1)           # (TB, S)

    m = jnp.max(vu, axis=-1, keepdims=True)              # (TB, 1)
    e = jnp.exp(vu - m)                                   # (TB, S)
    l = jnp.sum(e, axis=-1, keepdims=True)                # (TB, 1)
    acc = jnp.sum(e[:, :, None] * xf, axis=1)             # (TB, V)
    out_ref[...] = (acc / l).astype(out_ref.dtype)        # exact divide


def _attn_kernel_online(x_ref, wc_ref, out_ref, m_sc, l_sc, acc_sc):
    # Online softmax over the seq grid axis (axis 1).
    # m_sc: (TB,1) running max, l_sc: (TB,1) running denom, acc_sc: (TB,V) f32.
    s = pl.program_id(1)

    @pl.when(s == 0)
    def _():
        m_sc[...] = jnp.full_like(m_sc, -jnp.inf)
        l_sc[...] = jnp.zeros_like(l_sc)
        acc_sc[...] = jnp.zeros_like(acc_sc)

    xf = x_ref[...].astype(jnp.float32)                   # (TB, TS, V)
    wc = wc_ref[...].astype(jnp.float32)                  # (1, V)
    vu = jnp.sum(xf * wc[None, :, :], axis=-1)            # (TB, TS)

    m_prev = m_sc[...]
    m_new = jnp.maximum(m_prev, jnp.max(vu, axis=-1, keepdims=True))
    alpha = jnp.exp(m_prev - m_new)                        # rescale old partials
    e = jnp.exp(vu - m_new)                                # (TB, TS)

    l_sc[...] = alpha * l_sc[...] + jnp.sum(e, axis=-1, keepdims=True)
    acc_sc[...] = alpha * acc_sc[...] + jnp.sum(e[:, :, None] * xf, axis=1)
    m_sc[...] = m_new

    @pl.when(s == pl.num_programs(1) - 1)
    def _():
        out_ref[...] = (acc_sc[...] / l_sc[...]).astype(out_ref.dtype)


def _sublane_multiple(dtype):
    # Second-to-last block dim multiple: 8 for 4-byte, 16 for 2-byte, 32 for 1-byte.
    return {4: 8, 2: 16, 1: 32}.get(jnp.dtype(dtype).itemsize, 8)


def _largest_divisor_tile(dim, target, multiple):
    """Largest multiple of `multiple` that divides `dim` and is <= target.
    Falls back to the full extent (always a legal block shape)."""
    target = min(target, dim)
    best = None
    t = multiple
    while t <= target:
        if dim % t == 0:
            best = t
        t += multiple
    return best if best is not None else dim


def dot_product_attention(x, weight, bias, context, *,
                          tb=256, ts=1024, x_block_bytes=4 << 20):
    """x: (B, S, V); weight: (A, V); bias: (A,); context: (A, 1) -> (B, V)."""
    B, S, V = x.shape
    del bias  # (b . c) is constant along the softmax (seq) axis: exact no-op.

    # Collapse dense + context into one (1, V) vector: wc = context^T @ W.
    wc = jnp.dot(context.reshape(1, -1).astype(jnp.float32),
                 weight.astype(jnp.float32),
                 precision=jax.lax.Precision.HIGHEST)          # (1, V)

    itemsize = jnp.dtype(x.dtype).itemsize
    seq_mult = _sublane_multiple(x.dtype)   # x block (TB, TS, V): TS is the sublane dim
    out_mult = 8                            # out block (TB, V) is f32-ish: TB sublane dim

    # Seq tile: as large as possible within `ts` and the per-step byte budget
    # (assuming the minimum batch tile), multiple of the sublane packing.
    ts_cap = min(ts, max(seq_mult, x_block_bytes // (out_mult * V * itemsize)))
    TS = _largest_divisor_tile(S, ts_cap, seq_mult)

    # Batch tile: fill the remaining byte budget; keep >= 2 batch tiles when B
    # allows it so the "parallel" axis can shard across v7x's two TensorCores.
    tb_cap = min(tb, max(out_mult, x_block_bytes // (TS * V * itemsize)))
    if B >= 2 * out_mult:
        tb_cap = min(tb_cap, B // 2)
    TB = _largest_divisor_tile(B, tb_cap, out_mult)

    grid_b = pl.cdiv(B, TB)   # exact: TB divides B (or TB == B)
    grid_s = pl.cdiv(S, TS)   # exact: TS divides S (or TS == S)

    # VMEM budget: double-buffered native x block + a few f32 tile temporaries
    # (upcast, weighted product) + small accumulators; clamp inside v7x's
    # 64 MiB physical VMEM.
    x_blk = TB * TS * V * itemsize
    f32_blk = TB * TS * V * 4
    budget = 2 * x_blk + 3 * f32_blk + 8 * TB * V * 4 + (1 << 20)
    vmem_limit = int(min(max(budget, 32 << 20), 56 << 20))

    cost = pl.CostEstimate(
        flops=5 * B * S * V,
        transcendentals=B * S,
        bytes_accessed=B * S * V * itemsize + B * V * itemsize + V * 4,
    )

    if grid_s == 1:
        # Whole seq axis fits one tile: one-pass softmax, 1-D grid over batch,
        # no carry scratch, no per-seq-step grid overhead.
        grid_spec = pltpu.PrefetchScalarGridSpec(
            num_scalar_prefetch=0,
            grid=(grid_b,),
            in_specs=[
                pl.BlockSpec((TB, S, V), lambda b: (b, 0, 0)),   # x tile
                pl.BlockSpec((1, V), lambda b: (0, 0)),          # wc (broadcast)
            ],
            out_specs=pl.BlockSpec((TB, V), lambda b: (b, 0)),
        )
        kernel = _attn_kernel_single_pass
        dims = ("parallel",)
    else:
        grid_spec = pltpu.PrefetchScalarGridSpec(
            num_scalar_prefetch=0,
            grid=(grid_b, grid_s),
            in_specs=[
                pl.BlockSpec((TB, TS, V), lambda b, s: (b, s, 0)),  # x tile
                pl.BlockSpec((1, V), lambda b, s: (0, 0)),          # wc (broadcast)
            ],
            # Same output block across the seq axis -> resident accumulator target.
            out_specs=pl.BlockSpec((TB, V), lambda b, s: (b, 0)),
            scratch_shapes=[
                pltpu.VMEM((TB, 1), jnp.float32),   # running max
                pltpu.VMEM((TB, 1), jnp.float32),   # running denom
                pltpu.VMEM((TB, V), jnp.float32),   # f32 accumulator
            ],
        )
        kernel = _attn_kernel_online
        dims = ("parallel", "arbitrary")

    return pl.pallas_call(
        kernel,
        out_shape=jax.ShapeDtypeStruct((B, V), x.dtype),
        grid_spec=grid_spec,
        compiler_params=pltpu.CompilerParams(
            dimension_semantics=dims,
            vmem_limit_bytes=vmem_limit),
        cost_estimate=cost,
    )(x, wc)  # x passed in its native dtype; no wrapper upcast


def _reference(x, weight, bias, context):
    # Mirrors the PyTorch module exactly (bias included), in full f32 precision,
    # to prove the bias-drop / dense-collapse in the kernel is exact.
    hi = jax.lax.Precision.HIGHEST
    t = jnp.einsum("bsv,av->bsa", x, weight, precision=hi) + bias
    vu = jnp.einsum("bsa,ao->bs", t, context, precision=hi)
    score = jax.nn.softmax(vu, axis=-1)
    return jnp.sum(x * score[..., None], axis=-2)


if __name__ == "__main__":
    # batch, seq, value_size, attention_size
    B, S, V, A = 16, 16, 32, 16

    key = jax.random.PRNGKey(0)
    kx, kw, kb, kc = jax.random.split(key, 4)

    x = jax.random.normal(kx, (B, S, V), dtype=jnp.float32)

    # nn.Linear(value_size, attention_size): weight (A, V), bias (A,)
    lin_bound = 1.0 / math.sqrt(V)
    weight = jax.random.uniform(kw, (A, V), minval=-lin_bound, maxval=lin_bound,
                                dtype=jnp.float32)
    bias = jax.random.uniform(kb, (A,), minval=-lin_bound, maxval=lin_bound,
                              dtype=jnp.float32)

    # context: xavier_uniform on (A, 1)
    ctx_bound = math.sqrt(6.0 / (A + 1))
    context = jax.random.uniform(kc, (A, 1), minval=-ctx_bound, maxval=ctx_bound,
                                 dtype=jnp.float32)

    ref = _reference(x, weight, bias, context)

    # Path 1: default tiles -> whole seq axis in one tile, one-pass kernel,
    # 1-D batch-parallel grid (2 batch tiles).
    out_single = dot_product_attention(x, weight, bias, context)
    jax.block_until_ready(out_single)
    assert out_single.shape == (B, V)
    assert jnp.allclose(out_single, ref, atol=1e-4, rtol=1e-4), \
        "single-pass kernel mismatch vs JAX reference"

    # Path 2: force seq tiling (ts=8 -> 2 seq tiles) to exercise the online
    # softmax carry path on the same data.
    out_online = dot_product_attention(x, weight, bias, context, ts=8)
    jax.block_until_ready(out_online)
    assert jnp.allclose(out_online, ref, atol=1e-4, rtol=1e-4), \
        "online-softmax kernel mismatch vs JAX reference"

    print("KERNEL_OK")
</pallas_src>

<mosaic_0001>
module attributes {stable_mosaic.version = 11 : i64} {
  func.func @_attn_kernel_single_pass(%arg0: i32, %arg1: memref<8x16x32xf32, #tpu.memory_space<vmem>>, %arg2: memref<1x32xf32, #tpu.memory_space<vmem>>, %arg3: memref<8x32xf32, #tpu.memory_space<vmem>>) attributes {dimension_semantics = [#tpu.dimension_semantics<parallel>], iteration_bounds = array<i64: 2>, scalar_prefetch = 0 : i64, scratch_operands = 0 : i64, tpu.core_type = #tpu.core_type<tc>, window_params = [{transform_indices = @transform_0, window_bounds = array<i64: 8, 16, 32>}, {pipeline_mode = #tpu.pipeline_mode<synchronous>, transform_indices = @transform_1, window_bounds = array<i64: 1, 32>}, {transform_indices = @transform_2, window_bounds = array<i64: 8, 32>}]} {
    %c0 = arith.constant 0 : index
    %c0_0 = arith.constant 0 : index
    %c0_1 = arith.constant 0 : index
    %0 = vector.load %arg1[%c0, %c0_0, %c0_1] : memref<8x16x32xf32, #tpu.memory_space<vmem>>, vector<8x16x32xf32>
    %c0_2 = arith.constant 0 : index
    %c0_3 = arith.constant 0 : index
    %1 = vector.load %arg2[%c0_2, %c0_3] : memref<1x32xf32, #tpu.memory_space<vmem>>, vector<1x32xf32>
    %2 = vector.shape_cast %1 : vector<1x32xf32> to vector<1x1x32xf32>
    %3 = vector.broadcast %2 : vector<1x1x32xf32> to vector<8x16x32xf32>
    %4 = arith.mulf %0, %3 : vector<8x16x32xf32>
    %cst = arith.constant dense<0.000000e+00> : vector<8x16xf32>
    %5 = vector.multi_reduction <add>, %4, %cst [2] : vector<8x16x32xf32> to vector<8x16xf32>
    %cst_4 = arith.constant dense<0xFF800000> : vector<8xf32>
    %6 = vector.multi_reduction <maximumf>, %5, %cst_4 [1] : vector<8x16xf32> to vector<8xf32>
    %7 = vector.shape_cast %6 : vector<8xf32> to vector<8x1xf32>
    %8 = vector.broadcast %7 : vector<8x1xf32> to vector<8x16xf32>
    %9 = arith.subf %5, %8 : vector<8x16xf32>
    %10 = math.exp %9 : vector<8x16xf32>
    %cst_5 = arith.constant dense<0.000000e+00> : vector<8xf32>
    %11 = vector.multi_reduction <add>, %10, %cst_5 [1] : vector<8x16xf32> to vector<8xf32>
    %12 = vector.shape_cast %11 : vector<8xf32> to vector<8x1xf32>
    %13 = vector.shape_cast %10 : vector<8x16xf32> to vector<8x16x1xf32>
    %14 = vector.broadcast %13 : vector<8x16x1xf32> to vector<8x16x32xf32>
    %15 = arith.mulf %14, %0 : vector<8x16x32xf32>
    %cst_6 = arith.constant dense<0.000000e+00> : vector<8x32xf32>
    %16 = vector.multi_reduction <add>, %15, %cst_6 [1] : vector<8x16x32xf32> to vector<8x32xf32>
    %17 = vector.broadcast %12 : vector<8x1xf32> to vector<8x32xf32>
    %18 = arith.divf %16, %17 : vector<8x32xf32>
    %c0_7 = arith.constant 0 : index
    %c0_8 = arith.constant 0 : index
    %19 = vector.load %arg3[%c0_7, %c0_8] : memref<8x32xf32, #tpu.memory_space<vmem>>, vector<8x32xf32>
    tpu.vector_store %arg3[%c0_7, %c0_8], %18 {strides = array<i32>} : memref<8x32xf32, #tpu.memory_space<vmem>>, vector<8x32xf32>,
    return
  }
  func.func @transform_0(%arg0: i32) -> (i32, i32, i32) {
    %c0_i32 = arith.constant 0 : i32
    %c0_i32_0 = arith.constant 0 : i32
    %c0_i32_1 = arith.constant 0 : i32
    return %arg0, %c0_i32, %c0_i32_0 : i32, i32, i32
  }
  func.func @transform_1(%arg0: i32) -> (i32, i32) {
    %c0_i32 = arith.constant 0 : i32
    %c0_i32_0 = arith.constant 0 : i32
    %c0_i32_1 = arith.constant 0 : i32
    return %c0_i32, %c0_i32_0 : i32, i32
  }
  func.func @transform_2(%arg0: i32) -> (i32, i32) {
    %c0_i32 = arith.constant 0 : i32
    %c0_i32_0 = arith.constant 0 : i32
    return %arg0, %c0_i32 : i32, i32
  }
}

</mosaic_0001>

<bundles_post_ra>
// kernel: tpu_custom_call.1
= control target key start
LH: loop header
LB: loop body
LE: loop exit
PB: predicated region body
PF: predicated region fallthrough
CT: control target
= control target key end

     0   :  { %7 = vsyncpa [#allocation3], 0  ;;  %s1701_s0 = inlined_call_operand.hbm [shape: f32[16,16,32], index: 0, kind: input, shape index: {}]   ;;  %s1702_s1 = inlined_call_operand.hbm [shape: f32[1,32], index: 1, kind: input, shape index: {}]   ;;  %s1703_s2 = inlined_call_operand.hbm [shape: f32[16,32], index: 2, kind: output, shape index: {}]  }
   0x1   :  { %9 = vsyncpa [#allocation3 + $0x1], 0 }
   0x2   :  { %10 = vsyncpa [#allocation6], 0 }
   0x3   :  { %11 = vsyncpa [#allocation4], 0 }
   0x4   :  { %13 = vsyncpa [#allocation4 + $0x1], 0  ;;  %s1134_s9 = smov 0   ;;  %s1136_s10 = smov 0  }
   0x5   :  { %s1138_s11 = smov 0   ;;  %s1140_s12 = smov 0  }
   0x6 LB: > { %s1155_s13 = sadd.s32 4294967295, %s1113_s12   ;;  %s853_s14 = sadd.s32 4294967294, %s1113_s12   ;;  %s1113_s12 = sphi %s1140_s12, %s1740_s12   ;;  %s1109_s11 = sphi %s1138_s11, %s1739_s11   ;;  %s1105_s10 = sphi %s1136_s10, %s1738_s10   ;;  %s1101_s9 = sphi %s1134_s9, %s1737_s9  }
   0x7   : > { %s1159_s15 = sadd.s32 1, %s1113_s12   ;;  %s26_s16 = sadd.s32 1, %s1109_s11 }
   0x8   : > { %s23_s17 = ssub.s32 %s1113_s12, %s1159_s15  ;;  %p33_p0 = scmp.ne.s32.totalorder %s1109_s11, %s1105_s10 }
   0x9   : > { %p24_p1 = scmp.eq.s32.totalorder %s23_s17, 0  ;;  %p34_p2 = scmp.eq.s32.totalorder %s1113_s12, 0 }
   0xa   : > { %p39_p3 = scmp.ne.s32.totalorder %s1105_s10, %s1101_s9  ;;  %p40_p4 = scmp.eq.s32.totalorder %s1155_s13, 0 }
   0xb   : > { %s1171_s18 = scalar_select %p24_p1, %s1109_s11, %s26_s16  }
   0xc   : > { %p1173_p5 = por %p34_p2, %p33_p0  ;;  %p1179_p6 = por %p40_p4, %p39_p3 }
   0xd   : > { %p84_p7 = scmp.eq.s32.totalorder %s1155_s13, 1  ;;  %p90_p8 = scmp.eq.s32.totalorder %s853_s14, 1 }
   0xe   : > { %p854_p9 = scmp.ge.s32.totalorder %s1113_s12, 1  ;;  %p97_p10 = scmp.lt.s32.totalorder %s1113_s12, 3 }
   0xf   : > { %p1186_p11 = por %p84_p7, %p33_p0  ;;  %p1190_p12 = por %p90_p8, %p39_p3 }
  0x10   : > { %p1194_p13 = pnand %p854_p9, %p97_p10  ;;  %s109_s26 = sshll.u32 %s1702_s1, 4  ;;  %s110_s26 = int_to_ptr.hbm [resolvable:$true] %s109_s26 }
  0x11   : > { %s1115_s27 = smov [#allocation5]   ;;  %p892_p3 = scmp.lt.s32.totalorder %s1113_s12, 2 }
  0x12   : > { %p879_p1 = pneg %p1194_p13  ;;  %s111_s28 = sshll.u32 %s1115_s27, 4  ;;  %s112_s28 = int_to_ptr.vmem [resolvable:$true] %s111_s28 }
  0x13   : > { %s122_s29 = sand.u32 1, %s1109_s11   ;;  %p1210_p7 = pnand %p892_p3, %p1173_p5 }
  0x14   : > { %p880_p2 = pnand %p879_p1, %p40_p4  ;;  %s857_s3 = sshll.u32 %s122_s29, 7 }
  0x15   : > { %s870_s4 = sshll.u32 %s1113_s12, 7  ;;  %s126_s14 = scalar_lea.vmem [#allocation2], %s857_s3 }
  0x16   : > { %882 = dma.hbm_to_vmem [thread:$0]  (!%p880_p2), %s110_s26, 16, %s112_s28, [#allocation6]  }
  0x17   : > { %s132_s7 = scalar_lea.hbm %s1701_s0, %s870_s4  ;;  %s135_s16 = sshll.u32 %s126_s14, 4  ;;  %s136_s16 = int_to_ptr.vmem [resolvable:$true] %s135_s16 }
  0x18   : > { %s133_s8 = sshll.u32 %s132_s7, 4  ;;  %s123_s17 = scalar_lea.sflag [#allocation3], %s122_s29  ;;  %s134_s8 = int_to_ptr.hbm [resolvable:$true] %s133_s8 }
  0x19   : > { %s1013_s24 = sshra.s32 %s134_s8, 4  ;;  %p1017_p8 = pneg %p1210_p7  ;;  %s1014_s24 = int_to_ptr.hbm [resolvable:$true] %s1013_s24 }
  0x1a   : > { %s1015_s19 = scalar_lea.hbm %s1014_s24, 128  ;;  %s1020_s27 = scalar_lea.hbm %s1701_s0, 256 }
  0x1b   : > { %p1016_p5 = scmp.ne.s32.totalorder %s1014_s24, %s1015_s19  ;;  %p1021_p1 = scmp.lt.s32.totalorder %s1014_s24, %s1701_s0 }
  0x1c   : > { %p1022_p2 = scmp.lt.s32.totalorder %s1020_s27, %s1015_s19 }
  0x1d   : > { %p1018_p9 = pnand %p1017_p8, %p1016_p5 }
  0x1e   : > { %p1023_p3 = por %p1022_p2, %p1021_p1 }
  0x1f   : > { %p1019_p10 = pneg %p1018_p9 }
  0x21   : > { %p1024_p0 = pnand %p1023_p3, %p1019_p10 }
  0x23   : > { %1027 = shalt.err (!%p1024_p0)
}
  0x24   : > { %s1116_s29 = smov 128   ;;  %s1117_s3 = smov 8  }
  0x25   : > { %886 = dma.hbm_to_vmem [thread:$0]  (!%p1210_p7), %s134_s8, 2048, %s136_s16, %s123_s17, %s1116_s29, %s1116_s29, %s1117_s3  }
  0x26   : > { %147 = sbr.rel (%p1194_p13) target bundleno = 657 (0x291), region = 28  ;;  %s1231_s5 = sand.u32 (!%p1194_p13), 1, %s1105_s10  }
  0x27   : > { %s862_s6 = sshll.u32 (!%p1194_p13), %s1231_s5, 7  ;;  %s150_s7 = scalar_lea.sflag (!%p1194_p13), [#allocation3], %s1231_s5 }
  0x28   : > { %s1235_s14 = scalar_lea.vmem (!%p1194_p13), [#allocation2], %s862_s6 }
  0x2b   : > { %1088 = dma.done.wait (%p1179_p6), %s150_s7, 2048  }
  0x2c   : > { %1090 = vsyncadd (%p1179_p6), %s150_s7, 4294965248 }
  0x2d   : > { %1092 = dma.done.wait (%p40_p4), [#allocation6], 16  }
  0x2e   : > { %1094 = vsyncadd (%p40_p4), [#allocation6], 4294967280  ;;  %v1246_v0 = vld [vmem:[%s1235_s14 + $0x20] sm:$0xff]  ;;  %vm1704_vm0 = vcmask 261120   ;;  %v1249_v2 = vld [vmem:[%s1235_s14 + $0x10] sm:$0xff]  ;;  %v282_v57 = vlaneseq  ;;  %vm287_vm1 = vcmask 130112  }
  0x2f   : > { %v934_v1 = vld [vmem:[#allocation5] ss:$0 sm:$0xff]  ;;  %v1258_v7 = vld [vmem:[%s1235_s14 + $0x28] sm:$0xff]  ;;  %v1261_v8 = vld [vmem:[%s1235_s14 + $0x18] sm:$0xff]  ;;  %vm1711_vm2 = vcmask 1041409   ;;  %vm1710_vm3 = vcmask 1042434  }
  0x30   : > { %v1252_v3 = vld [vmem:[%s1235_s14] sm:$0xff]  ;;  %v205_v4 = vmul.f32 %v934_v1, %v1246_v0  ;;  %v203_v5 = vmul.f32 %v934_v1, %v1249_v2  ;;  %v1267_v12 = vld [vmem:[%s1235_s14 + $0x8] sm:$0xff]  ;;  %v206_v13 = vmul.f32 %v934_v1, %v1258_v7  ;;  %v204_v14 = vmul.f32 %v934_v1, %v1261_v8  ;;  %v1276_v19 = vld [vmem:[%s1235_s14 + $0x38] sm:$0xff]  ;;  %s864_s20 = sshll.u32 %s1231_s5, 3  ;;  %s866_s23 = sshll.u32 %s1155_s13, 3 }
  0x31   : > { %v201_v6 = vmul.f32 %v934_v1, %v1252_v3  ;;  %v202_v15 = vmul.f32 %v934_v1, %v1267_v12  ;;  %v1279_v20 = vld [vmem:[%s1235_s14 + $0x40] sm:$0xff]  ;;  %v1282_v21 = vld [vmem:[%s1235_s14 + $0x30] sm:$0xff]  ;;  %v208_v22 = vmul.f32 %v934_v1, %v1276_v19  ;;  %v1294_v29 = vld [vmem:[%s1235_s14 + $0x58] sm:$0xff]  ;;  %v1343_v59 = vand.u32 127, %v282_v57  ;;  %s768_s16 = scalar_lea.hbm %s1703_s2, %s866_s23  ;;  %s179_s13 = scalar_lea.vmem [#allocation7], %s864_s20 }
  0x32   : > { %v230_v9 = vsel %vm1704_vm0, %v205_v4, 0.0  ;;  %v224_v10 = vsel %vm1704_vm0, %v203_v5, 0.0  ;;  %v233_v16 = vsel %vm1704_vm0, %v206_v13, 0.0  ;;  %v227_v17 = vsel %vm1704_vm0, %v204_v14, 0.0  ;;  %v1291_v28 = vld [vmem:[%s1235_s14 + $0x50] sm:$0xff]  ;;  %v1297_v30 = vld [vmem:[%s1235_s14 + $0x48] sm:$0xff] }
  0x33   : > { %v218_v11 = vsel %vm1704_vm0, %v201_v6, 0.0  ;;  %231 = vadd.xlane.f32.xlu2 %v230_v9  ;;  %225 = vadd.xlane.f32.xlu1 %v224_v10  ;;  %v221_v18 = vsel %vm1704_vm0, %v202_v15, 0.0  ;;  %v209_v23 = vmul.f32 %v934_v1, %v1279_v20  ;;  %v207_v24 = vmul.f32 %v934_v1, %v1282_v21  ;;  %v1306_v37 = vld [vmem:[%s1235_s14 + $0x68] sm:$0xff]  ;;  %v1309_v38 = vld [vmem:[%s1235_s14 + $0x70] sm:$0xff]  ;;  %v1312_v39 = vld [vmem:[%s1235_s14 + $0x60] sm:$0xff]  ;;  %s770_s17 = sshll.u32 %s179_s13, 4  ;;  %s771_s17 = int_to_ptr.vmem [resolvable:$true] %s770_s17 }
  0x34   : > { %219 = vadd.xlane.f32.xlu0 %v218_v11  ;;  %v239_v25 = vsel %vm1704_vm0, %v208_v22, 0.0  ;;  %v211_v31 = vmul.f32 %v934_v1, %v1291_v28  ;;  %v212_v32 = vmul.f32 %v934_v1, %v1294_v29  ;;  %v210_v33 = vmul.f32 %v934_v1, %v1297_v30  ;;  %v1321_v46 = vld [vmem:[%s1235_s14 + $0x78] sm:$0xff]  ;;  %s772_s24 = sshll.u32 %s768_s16, 4  ;;  %s758_s19 = scalar_lea.sflag [#allocation4], %s1231_s5  ;;  %s773_s24 = int_to_ptr.hbm [resolvable:$true] %s772_s24 }
  0x35   : > { %v242_v26 = vsel %vm1704_vm0, %v209_v23, 0.0  ;;  %v236_v27 = vsel %vm1704_vm0, %v207_v24, 0.0  ;;  %v214_v40 = vmul.f32 %v934_v1, %v1306_v37  ;;  %v215_v41 = vmul.f32 %v934_v1, %v1309_v38  ;;  %s1057_s25 = sshra.s32 %s773_s24, 4  ;;  %s1063_s4 = scalar_lea.hbm %s1703_s2, 16  ;;  %s1058_s25 = int_to_ptr.hbm [resolvable:$true] %s1057_s25 }
  0x36   : > { %v248_v34 = vsel %vm1704_vm0, %v211_v31, 0.0  ;;  %v251_v35 = vsel %vm1704_vm0, %v212_v32, 0.0  ;;  %v245_v36 = vsel %vm1704_vm0, %v210_v33, 0.0  ;;  %v213_v42 = vmul.f32 %v934_v1, %v1312_v39  ;;  %s1059_s26 = scalar_lea.hbm %s1058_s25, 8  ;;  %p1064_p0 = scmp.lt.s32.totalorder %s1058_s25, %s1703_s2 }
  0x37   : > { %v257_v43 = vsel %vm1704_vm0, %v214_v40, 0.0  ;;  %v260_v44 = vsel %vm1704_vm0, %v215_v41, 0.0  ;;  %v216_v47 = vmul.f32 %v934_v1, %v1321_v46  ;;  %v1346_v60 = vadd.s32 4294967288, %v1343_v59  ;;  %p1060_p4 = scmp.ne.s32.totalorder %s1058_s25, %s1059_s26  ;;  %p1065_p7 = scmp.lt.s32.totalorder %s1063_s4, %s1059_s26 }
  0x38   : > { %v254_v45 = vsel %vm1704_vm0, %v213_v42, 0.0  ;;  %vm1709_vm4 = vcmask 1043459   ;;  %vm1708_vm5 = vcmask 1044484   ;;  %vm1707_vm6 = vcmask 1045509  }
  0x39   : > { %v263_v48 = vsel %vm1704_vm0, %v216_v47, 0.0  ;;  %vm1706_vm7 = vcmask 1046534   ;;  %vm1705_vm8 = vcmask 1047559   ;;  %vm325_vm9 = vcmask 130048   ;;  %p1061_p6 = pnand %p1060_p4, %p1186_p11  ;;  %p1066_p5 = por %p1065_p7, %p1064_p0 }
  0x3b   : > { %234 = vadd.xlane.f32.xlu2 %v233_v16  ;;  %228 = vadd.xlane.f32.xlu1 %v227_v17  ;;  %p1062_p13 = pneg %p1061_p6 }
  0x3c   : > { %222 = vadd.xlane.f32.xlu0 %v221_v18 }
  0x3d   : > { %p1067_p8 = pnand %p1066_p5, %p1062_p13 }
  0x43   : > { %240 = vadd.xlane.f32.xlu1 %v239_v25  ;;  %243 = vadd.xlane.f32.xlu2 %v242_v26 }
  0x44   : > { %237 = vadd.xlane.f32.xlu0 %v236_v27 }
  0x4b   : > { %249 = vadd.xlane.f32.xlu1 %v248_v34  ;;  %252 = vadd.xlane.f32.xlu2 %v251_v35 }
  0x4c   : > { %246 = vadd.xlane.f32.xlu0 %v245_v36 }
  0x53   : > { %258 = vadd.xlane.f32.xlu1 %v257_v43  ;;  %261 = vadd.xlane.f32.xlu2 %v260_v44 }
  0x54   : > { %255 = vadd.xlane.f32.xlu0 %v254_v45 }
  0x5c   : > { %264 = vadd.xlane.f32.xlu0 %v263_v48 }
  0xa6   : > { %v1325_v49 = vpop.xlane.xlu2 %231  ;;  %v1327_v50 = vpop.xlane.xlu1 %225 }
  0xa7   : > { %v1329_v51 = vpop.xlane.xlu0 %219  ;;  %v289_v63 = vperm.slane %v1327_v50, %v1343_v59  ;;  %v292_v9 = vperm.slane %v1325_v49, %v1343_v59 }
  0xa8   : > { %v284_v6 = vperm.slane %v1329_v51, %v1343_v59 }
  0xae   : > { %v1331_v52 = vpop.xlane.xlu1 %228  ;;  %v1333_v53 = vpop.xlane.xlu2 %234 }
  0xaf   : > { %v1335_v54 = vpop.xlane.xlu0 %222  ;;  %v290_v1 = vperm.slane %v1331_v52, %v1346_v60  ;;  %v293_v10 = vperm.slane %v1333_v53, %v1346_v60 }
  0xb0   : > { %v286_v4 = vperm.slane %v1335_v54, %v1346_v60 }
  0xb1   : > { %v291_v11 = vsel %vm287_vm1, %v290_v1, %v289_v63  ;;  %v294_v23 = vsel %vm287_vm1, %v293_v10, %v292_v9 }
  0xb2   : > { %v288_v13 = vsel %vm287_vm1, %v286_v4, %v284_v6  ;;  %v1118_v4 = vmov 0  }
  0xb3   : > { %v311_v24 = vsel %vm1711_vm2, %v291_v11, %v288_v13  ;;  %933 = vset.pattern.permute.xlu1 %v1118_v4  ;;  %932 = vset.pattern.permute.xlu0 %v1118_v4 }
  0xb4   : > { %v313_v35 = vsel %vm1710_vm3, %v294_v23, %v311_v24  ;;  %931 = vset.pattern.permute.xlu2 %v1118_v4 }
  0xb6   : > { %v1337_v55 = vpop.xlane.xlu1 %240  ;;  %v1341_v58 = vpop.xlane.xlu2 %243 }
  0xb7   : > { %v1339_v56 = vpop.xlane.xlu0 %237  ;;  %v296_v14 = vperm.slane %v1337_v55, %v1346_v60  ;;  %v298_v16 = vperm.slane %v1341_v58, %v1343_v59 }
  0xb8   : > { %v295_v15 = vperm.slane %v1339_v56, %v1343_v59 }
  0xba   : > { %v297_v25 = vsel %vm287_vm1, %v296_v14, %v295_v15 }
  0xbb   : > { %v315_v36 = vsel %vm1709_vm4, %v297_v25, %v313_v35 }
  0xbe   : > { %v1348_v61 = vpop.xlane.xlu1 %249  ;;  %v1358_v5 = vpop.xlane.xlu2 %252 }
  0xbf   : > { %v1350_v62 = vpop.xlane.xlu0 %246  ;;  %v301_v26 = vperm.slane %v1348_v61, %v1343_v59  ;;  %v302_v27 = vperm.slane %v1358_v5, %v1346_v60 }
  0xc0   : > { %v299_v17 = vperm.slane %v1350_v62, %v1346_v60 }
  0xc1   : > { %v303_v40 = vsel %vm287_vm1, %v302_v27, %v301_v26 }
  0xc2   : > { %v300_v31 = vsel %vm287_vm1, %v299_v17, %v298_v16 }
  0xc3   : > { %v317_v42 = vsel %vm1708_vm5, %v300_v31, %v315_v36 }
  0xc4   : > { %v319_v47 = vsel %vm1707_vm6, %v303_v40, %v317_v42 }
  0xc6   : > { %v1378_v22 = vpop.xlane.xlu1 %258  ;;  %v1392_v34 = vpop.xlane.xlu2 %261 }
  0xc7   : > { %v1376_v18 = vpop.xlane.xlu0 %255  ;;  %v305_v32 = vperm.slane %v1378_v22, %v1346_v60  ;;  %v307_v41 = vperm.slane %v1392_v34, %v1343_v59 }
  0xc8   : > { %v304_v33 = vperm.slane %v1376_v18, %v1343_v59 }
  0xca   : > { %v306_v44 = vsel %vm287_vm1, %v305_v32, %v304_v33 }
  0xcb   : > { %v321_v57 = vsel %vm1706_vm7, %v306_v44, %v319_v47 }
  0xcf   : > { %v1400_v43 = vpop.xlane.xlu0 %264 }
  0xd0   : > { %v308_v45 = vperm.slane %v1400_v43, %v1346_v60 }
  0xd2   : > { %v309_v48 = vsel %vm287_vm1, %v308_v45, %v307_v41 }
  0xd3   : > { %v323_v63 = vsel %vm1705_vm8, %v309_v48, %v321_v57 }
  0xd4   : > { %v326_v1 = vsel %vm325_vm9, %v323_v63, -inf }
  0xd5   : > { %327 = vmax.xlane.f32.xlu1 %v326_v1 }
 0x148   : > { %v1410_v6 = vpop.xlane.xlu1 %327 }
 0x149   : > { %v331_v9 = vperm.slane %v1410_v6, 1  ;;  %v330_v10 = vperm.slane %v1410_v6, 0  ;;  %v332_v15 = vperm.slane %v1410_v6, 2  ;;  %v334_v16 = vperm.slane %v1410_v6, 4 }
 0x14a   : > { %v335_v31 = vperm.slane %v1410_v6, 5  ;;  %v337_v42 = vperm.slane %v1410_v6, 7  ;;  %v336_v63 = vperm.slane %v1410_v6, 6 }
 0x14b   : > { %v348_v11 = vsub.f32 %v1327_v50, %v331_v9  ;;  %v347_v13 = vsub.f32 %v1335_v54, %v330_v10  ;;  %v346_v14 = vsub.f32 %v1329_v51, %v330_v10  ;;  %v351_v25 = vsub.f32 %v1333_v53, %v332_v15 }
 0x14c   : > { %v354_v26 = vsub.f32 %v1341_v58, %v334_v16  ;;  %v349_v50 = vsub.f32 %v1331_v52, %v331_v9  ;;  %v333_v54 = vperm.slane %v1410_v6, 3  ;;  %v357_v58 = vsub.f32 %v1358_v5, %v335_v31 }
 0x14d   : > { %v366_v17 = vmul.f32 1.442695, %v348_v11  ;;  %v364_v23 = vmul.f32 1.442695, %v347_v13  ;;  %v362_v24 = vmul.f32 1.442695, %v346_v14  ;;  %v350_v52 = vsub.f32 %v1325_v49, %v332_v15 }
 0x14e   : > { %v372_v27 = vmul.f32 1.442695, %v351_v25  ;;  %v378_v51 = vmul.f32 1.442695, %v354_v26  ;;  %v368_v33 = vmul.f32 1.442695, %v349_v50  ;;  %v353_v53 = vsub.f32 %v1337_v55, %v333_v54 }
 0x14f   : > { %935 = vpow2.f32 %v366_v17  ;;  %v384_v41 = vmul.f32 1.442695, %v357_v58  ;;  %v370_v45 = vmul.f32 1.442695, %v350_v52  ;;  %v356_v55 = vsub.f32 %v1348_v61, %v335_v31 }
 0x150   : > { %937 = vpow2.f32 %v364_v23  ;;  %v376_v40 = vmul.f32 1.442695, %v353_v53  ;;  %v360_v5 = vsub.f32 %v1392_v34, %v337_v42  ;;  %v352_v49 = vsub.f32 %v1339_v56, %v333_v54 }
 0x151   : > { %939 = vpow2.f32 %v362_v24  ;;  %v382_v57 = vmul.f32 1.442695, %v356_v55  ;;  %v359_v61 = vsub.f32 %v1378_v22, %v336_v63  ;;  %v355_v34 = vsub.f32 %v1350_v62, %v334_v16 }
 0x152   : > { %941 = vpow2.f32 %v372_v27  ;;  %v390_v1 = vmul.f32 1.442695, %v360_v5  ;;  %v374_v9 = vmul.f32 1.442695, %v352_v49  ;;  %v358_v17 = vsub.f32 %v1376_v18, %v336_v63 }
 0x153   : > { %943 = vpow2.f32 %v378_v51  ;;  %v388_v13 = vmul.f32 1.442695, %v359_v61  ;;  %v380_v14 = vmul.f32 1.442695, %v355_v34  ;;  %v361_v62 = vsub.f32 %v1400_v43, %v337_v42 }
 0x154   : > { %945 = vpow2.f32 %v368_v33  ;;  %v386_v24 = vmul.f32 1.442695, %v358_v17 }
 0x155   : > { %v936_v32 = vpop.eup %935  ;;  %947 = vpow2.f32 %v376_v40  ;;  %v392_v16 = vmul.f32 1.442695, %v361_v62 }
 0x156   : > { %v938_v35 = vpop.eup %937  ;;  %417 = vperm.xlu1 %933, %v936_v32   ;;  %949 = vpow2.f32 %v384_v41 }
 0x157   : > { %v940_v36 = vpop.eup %939  ;;  %414 = vperm.xlu0 %932, %v938_v35   ;;  %951 = vpow2.f32 %v370_v45 }
 0x158   : > { %411 = vperm.xlu2 %931, %v940_v36   ;;  %v942_v44 = vpop.eup %941  ;;  %953 = vpow2.f32 %v382_v57 }
 0x159   : > { %v944_v47 = vpop.eup %943  ;;  %955 = vpow2.f32 %v390_v1 }
 0x15a   : > { %v946_v48 = vpop.eup %945  ;;  %957 = vpow2.f32 %v374_v9 }
 0x15b   : > { %v948_v4 = vpop.eup %947  ;;  %959 = vpow2.f32 %v388_v13 }
 0x15c   : > { %v950_v10 = vpop.eup %949  ;;  %961 = vpow2.f32 %v380_v14 }
 0x15d   : > { %v952_v11 = vpop.eup %951  ;;  %963 = vpow2.f32 %v386_v24 }
 0x15e   : > { %426 = vperm.xlu1 %933, %v942_v44   ;;  %v954_v56 = vpop.eup %953  ;;  %965 = vpow2.f32 %v392_v16 }
 0x15f   : > { %435 = vperm.xlu0 %932, %v944_v47   ;;  %v956_v15 = vpop.eup %955 }
 0x160   : > { %420 = vperm.xlu2 %931, %v946_v48   ;;  %v958_v6 = vpop.eup %957 }
 0x161   : > { %v960_v23 = vpop.eup %959 }
 0x162   : > { %v962_v22 = vpop.eup %961 }
 0x163   : > { %v964_v25 = vpop.eup %963 }
 0x164   : > { %v966_v26 = vpop.eup %965 }
 0x166   : > { %432 = vperm.xlu1 %933, %v948_v4  }
 0x167   : > { %444 = vperm.xlu0 %932, %v950_v10  }
 0x168   : > { %423 = vperm.xlu2 %931, %v952_v11  }
 0x16e   : > { %441 = vperm.xlu1 %933, %v954_v56  }
 0x16f   : > { %453 = vperm.xlu0 %932, %v956_v15  }
 0x170   : > { %429 = vperm.xlu2 %931, %v958_v6  }
 0x176   : > { %450 = vperm.xlu1 %933, %v960_v23  }
 0x178   : > { %438 = vperm.xlu2 %931, %v962_v22  }
 0x180   : > { %447 = vperm.xlu2 %931, %v964_v25  }
 0x188   : > { %456 = vperm.xlu2 %931, %v966_v26  }
 0x1b2   : > { %v412_v50 = vpop.permute.xlu2 %411 }
 0x1b3   : > { %v509_v18 = vmul.f32 %v412_v50, %v1252_v3  ;;  %v458_v34 = vperm.slane %v412_v50, %v1343_v59 }
 0x1b5   : > { %v525_v58 = vsel %vm1704_vm0, %v509_v18, 0.0 }
 0x1ba   : > { %v421_v27 = vpop.permute.xlu2 %420 }
 0x1bb   : > { %v512_v51 = vmul.f32 %v421_v27, %v1261_v8  ;;  %v462_v13 = vperm.slane %v421_v27, %v1346_v60 }
 0x1bd   : > { %v535_v36 = vsel %vm1704_vm0, %v512_v51, 0.0 }
 0x1c2   : > { %v424_v54 = vpop.permute.xlu2 %423 }
 0x1c3   : > { %v513_v3 = vmul.f32 %v424_v54, %v1246_v0  ;;  %v464_v14 = vperm.slane %v424_v54, %v1343_v59 }
 0x1c5   : > { %v543_v45 = vsel %vm1704_vm0, %v513_v3, 0.0 }
 0x1c8   : > { %v418_v31 = vpop.permute.xlu1 %417 }
 0x1c9   : > { %v511_v32 = vmul.f32 %v418_v31, %v1249_v2  ;;  %v415_v33 = vpop.permute.xlu0 %414  ;;  %v461_v11 = vperm.slane %v418_v31, %v1343_v59 }
 0x1ca   : > { %v510_v35 = vmul.f32 %v415_v33, %v1267_v12  ;;  %v430_v43 = vpop.permute.xlu2 %429 }
 0x1cb   : > { %v534_v53 = vsel %vm1704_vm0, %v511_v32, 0.0  ;;  %v515_v49 = vmul.f32 %v430_v43, %v1282_v21  ;;  %v463_v17 = vsel %vm287_vm1, %v462_v13, %v461_v11  ;;  %v467_v24 = vperm.slane %v430_v43, %v1343_v59 }
 0x1cc   : > { %v1443_v52 = vadd.f32 %v535_v36, %v534_v53  ;;  %v526_v40 = vsel %vm1704_vm0, %v510_v35, 0.0 }
 0x1cd   : > { %v1446_v8 = vadd.f32 %v526_v40, %v525_v58  ;;  %v552_v4 = vsel %vm1704_vm0, %v515_v49, 0.0 }
 0x1d0   : > { %v427_v41 = vpop.permute.xlu1 %426 }
 0x1d1   : > { %v514_v2 = vmul.f32 %v427_v41, %v1258_v7  ;;  %v436_v42 = vpop.permute.xlu0 %435  ;;  %v465_v21 = vperm.slane %v427_v41, %v1346_v60 }
 0x1d2   : > { %v517_v12 = vmul.f32 %v436_v42, %v1279_v20  ;;  %v439_v44 = vpop.permute.xlu2 %438 }
 0x1d3   : > { %v544_v47 = vsel %vm1704_vm0, %v514_v2, 0.0  ;;  %v518_v5 = vmul.f32 %v439_v44, %v1297_v30  ;;  %v459_v30 = vperm.slane %v415_v33, %v1346_v60  ;;  %v466_v62 = vsel %vm287_vm1, %v465_v21, %v464_v14 }
 0x1d4   : > { %v1453_v48 = vadd.f32 %v544_v47, %v543_v45  ;;  %v561_v55 = vsel %vm1704_vm0, %v517_v12, 0.0  ;;  %v471_v18 = vperm.slane %v439_v44, %v1346_v60 }
 0x1d5   : > { %v562_v0 = vsel %vm1704_vm0, %v518_v5, 0.0  ;;  %v460_v23 = vsel %vm287_vm1, %v459_v30, %v458_v34  ;;  %v537_v5 = vrot.slane %v1443_v52, 4 }
 0x1d6   : > { %v1459_v57 = vadd.f32 %v562_v0, %v561_v55  ;;  %v482_v51 = vsel %vm1711_vm2, %v463_v17, %v460_v23  ;;  %v546_v49 = vrot.slane %v1453_v48, 4 }
 0x1d7   : > { %v483_v32 = vsel %vm1710_vm3, %v466_v62, %v482_v51 }
 0x1d8   : > { %v433_v7 = vpop.permute.xlu1 %432  ;;  %v564_v0 = vrot.slane %v1459_v57, 4  ;;  %v547_v30 = vadd.f32 %v546_v49, %v1453_v48 }
 0x1d9   : > { %v516_v20 = vmul.f32 %v433_v7, %v1276_v19  ;;  %v445_v63 = vpop.permute.xlu0 %444  ;;  %v468_v19 = vperm.slane %v433_v7, %v1346_v60 }
 0x1da   : > { %v448_v1 = vpop.permute.xlu2 %447  ;;  %v520_v61 = vmul.f32 %v445_v63, %v1294_v29  ;;  %v474_v33 = vperm.slane %v445_v63, %v1346_v60  ;;  %v565_v21 = vadd.f32 %v564_v0, %v1459_v57  ;;  %v548_v14 = vrot.slane %v547_v30, 2 }
 0x1db   : > { %v553_v9 = vsel %vm1704_vm0, %v516_v20, 0.0  ;;  %v476_v3 = vperm.slane %v448_v1, %v1343_v59  ;;  %v521_v20 = vmul.f32 %v448_v1, %v1312_v39 }
 0x1dc   : > { %v554_v10 = vadd.f32 %v553_v9, %v552_v4  ;;  %v571_v16 = vsel %vm1704_vm0, %v520_v61, 0.0  ;;  %v538_v4 = vadd.f32 %v537_v5, %v1443_v52  ;;  %v566_v39 = vrot.slane %v565_v21, 2 }
 0x1dd   : > { %v549_v23 = vadd.f32 %v548_v14, %v547_v30 }
 0x1de   : > { %v555_v7 = vrot.slane %v554_v10, 4 }
 0x1e0   : > { %v442_v56 = vpop.permute.xlu1 %441  ;;  %v556_v61 = vadd.f32 %v555_v7, %v554_v10 }
 0x1e1   : > { %v519_v15 = vmul.f32 %v442_v56, %v1291_v28  ;;  %v454_v6 = vpop.permute.xlu0 %453  ;;  %v469_v28 = vsel %vm287_vm1, %v468_v19, %v467_v24  ;;  %v473_v50 = vperm.slane %v442_v56, %v1343_v59  ;;  %v539_v19 = vrot.slane %v538_v4, 2 }
 0x1e2   : > { %v523_v29 = vmul.f32 %v454_v6, %v1309_v38  ;;  %v457_v22 = vpop.permute.xlu2 %456  ;;  %v470_v38 = vperm.slane %v436_v42, %v1343_v59  ;;  %v484_v35 = vsel %vm1709_vm4, %v469_v28, %v483_v32  ;;  %v479_v36 = vperm.slane %v454_v6, %v1343_v59 }
 0x1e3   : > { %v570_v25 = vsel %vm1704_vm0, %v519_v15, 0.0  ;;  %v524_v26 = vmul.f32 %v457_v22, %v1321_v46  ;;  %v475_v43 = vsel %vm287_vm1, %v474_v33, %v473_v50  ;;  %v480_v53 = vperm.slane %v457_v22, %v1346_v60 }
 0x1e4   : > { %v572_v27 = vadd.f32 %v571_v16, %v570_v25  ;;  %v588_v54 = vsel %vm1704_vm0, %v523_v29, 0.0  ;;  %v472_v40 = vsel %vm287_vm1, %v471_v18, %v470_v38  ;;  %v528_v59 = vrot.slane %v1446_v8, 4 }
 0x1e5   : > { %v589_v31 = vsel %vm1704_vm0, %v524_v26, 0.0  ;;  %v485_v2 = vsel %vm1708_vm5, %v472_v40, %v484_v35  ;;  %v481_v44 = vsel %vm287_vm1, %v480_v53, %v479_v36  ;;  %v557_v1 = vrot.slane %v556_v61, 2 }
 0x1e6   : > { %v590_v46 = vadd.f32 %v589_v31, %v588_v54  ;;  %v486_v12 = vsel %vm1707_vm6, %v475_v43, %v485_v2  ;;  %v573_v63 = vrot.slane %v572_v27, 4  ;;  %v529_v9 = vadd.f32 %v528_v59, %v1446_v8 }
 0x1e7   : > { %v540_v8 = vadd.f32 %v539_v19, %v538_v4  ;;  %v567_v24 = vadd.f32 %v566_v39, %v565_v21  ;;  %v558_v48 = vadd.f32 %v557_v1, %v556_v61  ;;  %v550_v16 = vrot.slane %v549_v23, 1 }
 0x1e8   : > { %v451_v58 = vpop.permute.xlu1 %450  ;;  %v574_v34 = vadd.f32 %v573_v63, %v572_v27  ;;  %v530_v56 = vrot.slane %v529_v9, 2  ;;  %v591_v15 = vrot.slane %v590_v46, 4 }
 0x1e9   : > { %v477_v41 = vperm.slane %v451_v58, %v1346_v60  ;;  %v522_v60 = vmul.f32 %v451_v58, %v1306_v37  ;;  %v579_v37 = vsel %vm1704_vm0, %v521_v20, 0.0  ;;  %v541_v22 = vrot.slane %v540_v8, 1 }
 0x1ea   : > { %v575_v52 = vrot.slane %v574_v34, 2  ;;  %v531_v17 = vadd.f32 %v530_v56, %v529_v9  ;;  %v592_v29 = vadd.f32 %v591_v15, %v590_v46  ;;  %v568_v25 = vrot.slane %v567_v24, 1 }
 0x1eb   : > { %v478_v42 = vsel %vm287_vm1, %v477_v41, %v476_v3  ;;  %v580_v11 = vsel %vm1704_vm0, %v522_v60, 0.0  ;;  %v559_v26 = vrot.slane %v558_v48, 1  ;;  %v1531_v32 = vadd.f32 %v541_v22, %v540_v8 }
 0x1ec   : > { %v487_v45 = vsel %vm1706_vm7, %v478_v42, %v486_v12  ;;  %v581_v13 = vadd.f32 %v580_v11, %v579_v37  ;;  %v576_v57 = vadd.f32 %v575_v52, %v574_v34  ;;  %v532_v62 = vrot.slane %v531_v17, 1 }
 0x1ed   : > { %v488_v47 = vsel %vm1705_vm8, %v481_v44, %v487_v45  ;;  %v593_v50 = vrot.slane %v592_v29, 2  ;;  %v1536_v46 = vadd.f32 %v550_v16, %v549_v23  ;;  %v1538_v35 = vadd.f32 %v568_v25, %v567_v24 }
 0x1ee   : > { %v490_v55 = vsel %vm325_vm9, %v488_v47, 0.0  ;;  %v582_v6 = vrot.slane %v581_v13, 4  ;;  %v577_v38 = vrot.slane %v576_v57, 1  ;;  %v1533_v33 = vadd.f32 %v532_v62, %v531_v17 }
 0x1ef   : > { %491 = vadd.xlane.f32.xlu1 %v490_v55  ;;  %v1542_v36 = vadd.f32 %v559_v26, %v558_v48  ;;  %v1544_v53 = vadd.f32 %v593_v50, %v592_v29 }
 0x1f0   : > { %v583_v10 = vadd.f32 %v582_v6, %v581_v13  ;;  %v1548_v40 = vadd.f32 %v577_v38, %v576_v57 }
 0x1f2   : > { %v584_v18 = vrot.slane %v583_v10, 2 }
 0x1f4   : > { %v1550_v3 = vadd.f32 %v584_v18, %v583_v10 }
 0x262   : > { %v1516_v28 = vpop.xlane.xlu1 %491 }
 0x263   : > { %v1519_v27 = vrot.slane %v1516_v28, 1  ;;  %v1522_v54 = vrot.slane %v1516_v28, 2  ;;  %v1525_v51 = vrot.slane %v1516_v28, 3  ;;  %v1528_v31 = vrot.slane %v1516_v28, 4 }
 0x264   : > { %967 = vrcp.f32 %v1516_v28  ;;  %v624_v43 = vand.u32 2147483648, %v1516_v28  ;;  %v1555_v2 = vrot.slane %v1516_v28, 5  ;;  %v1558_v42 = vrot.slane %v1516_v28, 6 }
 0x265   : > { %969 = vrcp.f32 %v1519_v27  ;;  %v639_v58 = vand.u32 2147483648, %v1519_v27  ;;  %v637_v41 = vand.u32 2147483647, %v1519_v27  ;;  %v1561_v12 = vrot.slane %v1516_v28, 7 }
 0x266   : > { %971 = vrcp.f32 %v1522_v54  ;;  %v652_v44 = vand.u32 2147483647, %v1522_v54  ;;  %vm618_vm10 = vweird.f32 %v1516_v28  ;;  %v622_v47 = vand.u32 2147483647, %v1516_v28 }
 0x267   : > { %973 = vrcp.f32 %v1525_v51  ;;  %v1568_v55 = vor.u32 1.1754944e-38, %v624_v43  ;;  %vm633_vm11 = vweird.f32 %v1519_v27  ;;  %v640_v60 = vor.u32 1.1754944e-38, %v639_v58 }
 0x268   : > { %975 = vrcp.f32 %v1528_v31  ;;  %vm648_vm12 = vweird.f32 %v1522_v54  ;;  %v654_v49 = vand.u32 2147483648, %v1522_v54  ;;  %vm1576_vm13 = vcmp.eq.f32.partialorder %v637_v41, 8.507059e+37 }
 0x269   : > { %vm663_vm14 = vweird.f32 %v1525_v51  ;;  %v667_v63 = vand.u32 2147483647, %v1525_v51  ;;  %v669_v4 = vand.u32 2147483648, %v1525_v51  ;;  %vm1584_vm15 = vcmp.eq.f32.partialorder %v652_v44, 8.507059e+37 }
 0x26a   : > { %v1564_v45 = vpop.eup %967  ;;  %vm678_vm1 = vweird.f32 %v1528_v31  ;;  %v682_v61 = vand.u32 2147483647, %v1528_v31  ;;  %vm1590_vm9 = vcmp.eq.f32.partialorder %v622_v47, 8.507059e+37  ;;  %v684_v56 = vand.u32 2147483648, %v1528_v31 }
 0x26b   : > { %v970_v5 = vpop.eup %969  ;;  %v614_v59 = vmul.f32 %v1564_v45, %v1516_v28  ;;  %977 = vrcp.f32 %v1555_v2  ;;  %vm619_vm0 = vweird.f32 %v1564_v45  ;;  %v655_v52 = vor.u32 1.1754944e-38, %v654_v49 }
 0x26c   : > { %v972_v0 = vpop.eup %971  ;;  %v629_v7 = vmul.f32 %v970_v5, %v1519_v27  ;;  %vm634_vm8 = vweird.f32 %v970_v5  ;;  %vm1603_vm6 = vmor %vm618_vm10, %vm619_vm0  ;;  %979 = vrcp.f32 %v1558_v42  ;;  %vm1610_vm3 = vcmp.eq.f32.partialorder %v667_v63, 8.507059e+37 }
 0x26d   : > { %v974_v9 = vpop.eup %973  ;;  %v615_v11 = vsub.f32 1.0, %v614_v59  ;;  %v644_v30 = vmul.f32 %v972_v0, %v1522_v54  ;;  %vm649_vm7 = vweird.f32 %v972_v0  ;;  %vm635_vm4 = vmor %vm633_vm11, %vm634_vm8  ;;  %v670_v28 = vor.u32 1.1754944e-38, %v669_v4 }
 0x26e   : > { %v976_v37 = vpop.eup %975  ;;  %v630_v13 = vsub.f32 1.0, %v629_v7  ;;  %v659_v19 = vmul.f32 %v974_v9, %v1525_v51  ;;  %vm664_vm5 = vweird.f32 %v974_v9  ;;  %vm650_vm0 = vmor %vm648_vm12, %vm649_vm7  ;;  %vm683_vm10 = vcmp.eq.f32.partialorder %v682_v61, 8.507059e+37 }
 0x26f   : > { %v616_v14 = vmul.f32 %v1564_v45, %v615_v11  ;;  %v645_v39 = vsub.f32 1.0, %v644_v30  ;;  %v674_v1 = vmul.f32 %v976_v37, %v1528_v31  ;;  %vm679_vm2 = vweird.f32 %v976_v37  ;;  %vm665_vm8 = vmor %vm663_vm14, %vm664_vm5 }
 0x270   : > { %v631_v15 = vmul.f32 %v970_v5, %v630_v13  ;;  %v660_v6 = vsub.f32 1.0, %v659_v19  ;;  %v685_v54 = vor.u32 1.1754944e-38, %v684_v56  ;;  %v586_v49 = vrot.slane %v1550_v3, 1 }
 0x271   : > { %v617_v8 = vadd.f32 %v1564_v45, %v616_v14  ;;  %v646_v17 = vmul.f32 %v972_v0, %v645_v39  ;;  %v675_v23 = vsub.f32 1.0, %v674_v1  ;;  %v978_v62 = vpop.eup %977  ;;  %981 = vrcp.f32 %v1561_v12 }
 0x272   : > { %v632_v48 = vadd.f32 %v970_v5, %v631_v15  ;;  %v661_v29 = vmul.f32 %v974_v9, %v660_v6  ;;  %v689_v58 = vmul.f32 %v978_v62, %v1555_v2  ;;  %v980_v47 = vpop.eup %979  ;;  %v712_v61 = vand.u32 2147483647, %v1558_v42 }
 0x273   : > { %v647_v57 = vadd.f32 %v972_v0, %v646_v17  ;;  %v676_v22 = vmul.f32 %v976_v37, %v675_v23  ;;  %v621_v16 = vsel %vm1603_vm6, %v1564_v45, %v617_v8  ;;  %v697_v45 = vand.u32 2147483647, %v1555_v2 }
 0x274   : > { %v636_v25 = vsel %vm635_vm4, %v970_v5, %v632_v48  ;;  %v662_v26 = vadd.f32 %v974_v9, %v661_v29  ;;  %vm680_vm4 = vmor %vm678_vm1, %vm679_vm2  ;;  %v626_v41 = vsel %vm1590_vm9, %v1568_v55, %v621_v16  ;;  %vm693_vm2 = vweird.f32 %v1555_v2 }
 0x275   : > { %v641_v50 = vsel %vm1576_vm13, %v640_v60, %v636_v25  ;;  %v651_v27 = vsel %vm650_vm0, %v972_v0, %v647_v57  ;;  %v677_v38 = vadd.f32 %v976_v37, %v676_v22  ;;  %v690_v60 = vsub.f32 1.0, %v689_v58 }
 0x276   : > { %v656_v18 = vsel %vm1584_vm15, %v655_v52, %v651_v27  ;;  %v666_v43 = vsel %vm665_vm8, %v974_v9, %v662_v26  ;;  %v642_v5 = vmul.f32 %v641_v50, %v1531_v32  ;;  %v699_v0 = vand.u32 2147483648, %v1555_v2 }
 0x277   : > { %v671_v51 = vsel %vm1610_vm3, %v670_v28, %v666_v43  ;;  %v681_v44 = vsel %vm680_vm4, %v976_v37, %v677_v38  ;;  %v657_v59 = vmul.f32 %v656_v18, %v1536_v46  ;;  %v704_v55 = vmul.f32 %v980_v47, %v1558_v42  ;;  %v982_v14 = vpop.eup %981 }
 0x278   : > { %v686_v31 = vsel %vm683_vm10, %v685_v54, %v681_v44  ;;  %v672_v7 = vmul.f32 %v671_v51, %v1542_v36  ;;  %v691_v20 = vmul.f32 %v978_v62, %v690_v60  ;;  %vm694_vm3 = vweird.f32 %v978_v62 }
 0x279   : > { %v627_v32 = vmul.f32 %v626_v41, %v1533_v33  ;;  %v687_v46 = vmul.f32 %v686_v31, %v1538_v35  ;;  %vm698_vm5 = vcmp.eq.f32.partialorder %v697_v45, 8.507059e+37  ;;  %v705_v63 = vsub.f32 1.0, %v704_v55  ;;  %vm695_vm6 = vmor %vm693_vm2, %vm694_vm3 }
 0x27a   : > { %v692_v4 = vadd.f32 %v978_v62, %v691_v20  ;;  %v714_v9 = vand.u32 2147483648, %v1558_v42  ;;  %v741_v11 = vrot.slane %v642_v5, 7  ;;  %v743_v30 = vrot.slane %v657_v59, 6 }
 0x27b   : > { %v700_v21 = vor.u32 1.1754944e-38, %v699_v0  ;;  %v706_v36 = vmul.f32 %v980_v47, %v705_v63  ;;  %vm709_vm7 = vweird.f32 %v980_v47  ;;  %vm708_vm11 = vweird.f32 %v1558_v42 }
 0x27c   : > { %v696_v37 = vsel %vm695_vm6, %v978_v62, %v692_v4  ;;  %vm1728_vm12 = vcmask 1041409   ;;  %v745_v35 = vrot.slane %v672_v7, 5  ;;  %vm1729_vm13 = vcmask 1042434   ;;  %vm710_vm14 = vmor %vm708_vm11, %vm709_vm7 }
 0x27d   : > { %v742_v33 = vsel %vm1728_vm12, %v741_v11, %v627_v32  ;;  %v701_v34 = vsel %vm698_vm5, %v700_v21, %v696_v37  ;;  %v707_v13 = vadd.f32 %v980_v47, %v706_v36  ;;  %v747_v56 = vrot.slane %v687_v46, 4 }
 0x27e   : > { %v744_v19 = vsel %vm1729_vm13, %v743_v30, %v742_v33  ;;  %v587_v2 = vadd.f32 %v586_v49, %v1550_v3  ;;  %v702_v39 = vmul.f32 %v701_v34, %v1548_v40  ;;  %v715_v1 = vor.u32 1.1754944e-38, %v714_v9 }
 0x27f   : > { %vm1730_vm15 = vcmask 1043459   ;;  %v711_v52 = vsel %vm710_vm14, %v980_v47, %v707_v13  ;;  %vm713_vm1 = vcmp.eq.f32.partialorder %v712_v61, 8.507059e+37  ;;  %v719_v42 = vmul.f32 %v982_v14, %v1561_v12 }
 0x280   : > { %v746_v15 = vsel %vm1730_vm15, %v745_v35, %v744_v19  ;;  %vm1731_vm9 = vcmask 1044484   ;;  %v716_v8 = vsel %vm713_vm1, %v715_v1, %v711_v52  ;;  %v749_v17 = vrot.slane %v702_v39, 3 }
 0x281   : > { %v748_v6 = vsel %vm1731_vm9, %v747_v56, %v746_v15  ;;  %v717_v23 = vmul.f32 %v716_v8, %v587_v2  ;;  %v720_v24 = vsub.f32 1.0, %v719_v42  ;;  %v595_v3 = vrot.slane %v1544_v53, 1 }
 0x282   : > { %v729_v48 = vand.u32 2147483648, %v1561_v12  ;;  %vm1732_vm0 = vcmask 1045509   ;;  %vm724_vm8 = vweird.f32 %v982_v14  ;;  %v727_v57 = vand.u32 2147483647, %v1561_v12 }
 0x283   : > { %v750_v40 = vsel %vm1732_vm0, %v749_v17, %v748_v6  ;;  %v721_v29 = vmul.f32 %v982_v14, %v720_v24  ;;  %v751_v10 = vrot.slane %v717_v23, 2  ;;  %vm723_vm10 = vweird.f32 %v1561_v12 }
 0x284   : > { %vm1733_vm4 = vcmask 1046534   ;;  %vm725_vm2 = vmor %vm723_vm10, %vm724_vm8  ;;  %v730_v16 = vor.u32 1.1754944e-38, %v729_v48  ;;  %v596_v25 = vadd.f32 %v595_v3, %v1544_v53  ;;  %vm728_vm3 = vcmp.eq.f32.partialorder %v727_v57, 8.507059e+37 }
 0x285   : > { %v722_v22 = vadd.f32 %v982_v14, %v721_v29  ;;  %v752_v62 = vsel %vm1733_vm4, %v751_v10, %v750_v40  ;;  %vm1734_vm5 = vcmask 1047559   ;;  %vm1735_vm6 = vcmask 261120  }
 0x287   : > { %v726_v26 = vsel %vm725_vm2, %v982_v14, %v722_v22 }
 0x288   : > { %v731_v28 = vsel %vm728_vm3, %v730_v16, %v726_v26 }
 0x289   : > { %v732_v50 = vmul.f32 %v731_v28, %v596_v25 }
 0x28b   : > { %v753_v12 = vrot.slane %v732_v50, 1 }
 0x28d   : > { %v754_v27 = vsel %vm1734_vm5, %v753_v12, %v752_v62 }
 0x28e   : > { %756 = vst.msk [vmem:[%s179_s13] sm:$0xff] %vm1735_vm6, %v754_v27 }
 0x28f   : > { %1070 = shalt.err (!%p1067_p8)
}
 0x290   : > { %877 = dma.vmem_to_hbm [thread:$0]  (%p1186_p11), %s771_s17, 128, %s773_s24, %s758_s19  }
 0x291 PF: > { %s784_s5 = sand.u32 1, %s1101_s9   ;;  %p1736_p9 = scmp.ge.s32.totalorder %s1113_s12, 2 }
 0x292   : > { %s785_s6 = scalar_lea.sflag [#allocation4], %s784_s5 }
 0x293   : > { %p888_p10 = pnand %p1736_p9, %p1190_p12 }
 0x295   : > { %p889_p1 = pneg %p888_p10 }
 0x297   : > { %1096 = dma.done.wait (%p889_p1), %s785_s6, 128  }
 0x298   : > { %1098 = vsyncadd (%p889_p1), %s785_s6, 4294967168  ;;  %p16_p2 = scmp.ge.s32.totalorder %s1159_s15, 4   ;;  %s1737_s9 = smov %s1105_s10 }
 0x299   : > { %s1738_s10 = smov %s1109_s11  ;;  %s1739_s11 = smov %s1171_s18 }
 0x29a   : > { %s1740_s12 = smov %s1159_s15  ;;  %18 = sbr.rel (!%p16_p2) target bundleno = 6 (0x6), region = 77 }
 0x29f   :  { %791 = vsyncpa [#allocation3], 1 }
 0x2a0   :  { %793 = vsyncpa [#allocation3 + $0x1], 1 }
 0x2a1   :  { %794 = vsyncpa [#allocation6], 1 }
 0x2a2   :  { %795 = vsyncpa [#allocation4], 1 }
 0x2a3   :  { %797 = vsyncpa [#allocation4 + $0x1], 1 }

</bundles_post_ra>
